<compile_context>
chip_gen: v7x
topology: tpu7x:2x2x1
jax: 0.10.0
libtpu: 0.0.40
codegen_flags: <defaults>
</compile_context>

<pallas_src>
import math
import functools

import jax
import jax.numpy as jnp
from jax import lax
from jax.experimental import pallas as pl
from jax.experimental.pallas import tpu as pltpu


def _attention_kernel(hs_ref, kv_ref,
                      wq_ref, bq_ref, wk_ref, bk_ref, wv_ref, bv_ref,
                      wo_ref, bo_ref,
                      out_ref,
                      k_heads, v_heads, ctx_ref,
                      *, num_heads, head_dim):
    f32 = jnp.float32
    bf16 = jnp.bfloat16
    qi = pl.program_id(1)

    # --- K/V projection: once per batch element (qi == 0), stored per-head in
    # VMEM scratch so later grid steps reuse it (no redundant 2*Skv*H^2 MACs).
    @pl.when(qi == 0)
    def _():
        kvx = kv_ref[0]                                              # (Skv, H) bf16
        k = jnp.dot(kvx, wk_ref[...], preferred_element_type=f32) + bk_ref[0]
        v = jnp.dot(kvx, wv_ref[...], preferred_element_type=f32) + bv_ref[0]
        kb = k.astype(bf16)
        vb = v.astype(bf16)
        for h in range(num_heads):
            lo = h * head_dim
            k_heads[h] = kb[:, lo:lo + head_dim]
            v_heads[h] = vb[:, lo:lo + head_dim]

    # --- Q projection for this query tile.  1/sqrt(head_dim) is folded into
    # Wq / bq at parameter-preparation time (no in-kernel scale multiply).
    hs = hs_ref[0]                                                   # (TQ, H) bf16
    q = jnp.dot(hs, wq_ref[...], preferred_element_type=f32) + bq_ref[0]
    qb = q.astype(bf16)

    # Contract last dims of q_h / k_h -> no materialized K^T.
    score_dims = (((1,), (1,)), ((), ()))

    # TODO(synk): for head_dim < 128 the per-head Q slice is lane-unaligned;
    # grouping heads into 128-lane chunks with a batched dot would remove the
    # per-head repack, left out to keep the Mosaic lowering simple/robust.
    for h in range(num_heads):
        lo = h * head_dim
        qh = qb[:, lo:lo + head_dim]                                 # (TQ,  hd) bf16
        kh = k_heads[h]                                              # (Skv, hd) bf16
        vh = v_heads[h]                                              # (Skv, hd) bf16

        scores = lax.dot_general(qh, kh, score_dims,
                                 preferred_element_type=f32)         # (TQ, Skv) f32

        # Numerically stable softmax, fully in f32 (v5e-safe); divide via the
        # EUP approximate reciprocal (separate issue slot, nearly free).
        scores = scores - jnp.max(scores, axis=-1, keepdims=True)
        e = jnp.exp(scores)
        inv = pl.reciprocal(jnp.sum(e, axis=-1, keepdims=True), approx=True)
        probs = (e * inv).astype(bf16)
        # attn_dropout: identity (eval mode)

        ctx_h = jnp.dot(probs, vh, preferred_element_type=f32)       # (TQ, hd) f32
        ctx_ref[:, lo:lo + head_dim] = ctx_h.astype(bf16)

    # --- Single K=H output projection (full MXU depth) from the assembled
    # lane-dense (TQ, H) context, instead of per-head K=head_dim accumulation.
    out = jnp.dot(ctx_ref[...], wo_ref[...], preferred_element_type=f32) + bo_ref[0]
    # proj_dropout: identity (eval mode)
    out_ref[0] = out.astype(out_ref.dtype)


def _pick_q_tile(sq):
    """Return (tile, padded_sq).  Tiles up to 512 rows; pads non-dividing long
    sequences to a multiple of 256 instead of one giant block."""
    if sq <= 512:
        return sq, sq
    for t in (512, 256, 128):
        if sq % t == 0:
            return t, sq
    t = 256
    return t, ((sq + t - 1) // t) * t


def prepare_params(params, hidden_size, num_heads):
    """One-time parameter preparation (do at init, not per forward call):
    bf16 weights, f32 (1,H) biases, and 1/sqrt(head_dim) folded into the
    query projection weight & bias."""
    wq, bq, wk, bk, wv, bv, wo, bo = params
    head_dim = hidden_size // num_heads
    scale = 1.0 / math.sqrt(head_dim)
    f32 = jnp.float32
    bf16 = jnp.bfloat16
    H = hidden_size
    return (
        (wq * scale).astype(bf16), (bq * scale).reshape(1, H).astype(f32),
        wk.astype(bf16),           bk.reshape(1, H).astype(f32),
        wv.astype(bf16),           bv.reshape(1, H).astype(f32),
        wo.astype(bf16),           bo.reshape(1, H).astype(f32),
    )


@functools.partial(jax.jit, static_argnames=("num_heads",))
def attention_cross_modal(hidden_states, kv, prepared_params, *, num_heads):
    """hidden_states: (B, Sq, H), kv: (B, Skv, H) -> (B, Sq, H)."""
    B, Sq, H = hidden_states.shape
    _, Skv, _ = kv.shape
    assert H % num_heads == 0
    head_dim = H // num_heads

    wq, bq, wk, bk, wv, bv, wo, bo = prepared_params

    bf16 = jnp.bfloat16
    hs_b = hidden_states.astype(bf16)
    kv_b = kv.astype(bf16)

    tq, sq_pad = _pick_q_tile(Sq)
    if sq_pad != Sq:
        hs_b = jnp.pad(hs_b, ((0, 0), (0, sq_pad - Sq), (0, 0)))
    n_q = sq_pad // tq

    # --- Rough VMEM footprint (bytes); raise the scoped limit only if needed,
    # capped at 64 MiB so it is valid on every generation (v7x physical VMEM).
    out_bytes = jnp.dtype(hidden_states.dtype).itemsize
    est = (
        4 * H * H * 2 * 2                  # 4 weight matrices, double-buffered
        + 2 * (tq * H * 2) * 2             # hs input blocks
        + Skv * H * 2 * 2                  # kv block
        + 2 * Skv * H * 2 + tq * H * 2     # K/V per-head scratch + ctx scratch
        + 2 * Skv * H * 4 + tq * H * 4     # f32 K/V/Q temporaries
        + 4 * tq * Skv * 4                 # score / prob temporaries
        + tq * H * out_bytes * 2           # output blocks
    )
    cp_kwargs = {"dimension_semantics": ("parallel", "arbitrary")}
    if est > 24 * 1024 * 1024:
        cp_kwargs["vmem_limit_bytes"] = min(64 * 1024 * 1024,
                                            max(32 * 1024 * 1024, int(est * 1.25)))
    # TODO(synk): for very long Skv (v7x 64 MiB VMEM) add an Skv grid axis with
    # flash-style online softmax instead of holding all of K/V resident.

    cost = pl.CostEstimate(
        flops=(4 * B * sq_pad * H * H + 4 * B * Skv * H * H
               + 4 * B * num_heads * sq_pad * Skv * head_dim),
        transcendentals=B * num_heads * sq_pad * Skv,
        bytes_accessed=(2 * (B * sq_pad * H + B * Skv * H) + 8 * H * H
                        + B * sq_pad * H * out_bytes),
    )

    kernel = functools.partial(_attention_kernel,
                               num_heads=num_heads, head_dim=head_dim)

    # Weights/biases have constant index maps -> DMA'd once per call and kept
    # resident (pl.Buffered(1) would halve their residency; omitted for
    # lowering robustness).
    weight_spec = pl.BlockSpec((H, H), lambda b, qi: (0, 0))
    bias_spec = pl.BlockSpec((1, H), lambda b, qi: (0, 0))

    out = pl.pallas_call(
        kernel,
        out_shape=jax.ShapeDtypeStruct((B, sq_pad, H), hidden_states.dtype),
        grid_spec=pltpu.PrefetchScalarGridSpec(
            num_scalar_prefetch=0,
            grid=(B, n_q),
            in_specs=[
                pl.BlockSpec((1, tq, H), lambda b, qi: (b, qi, 0)),    # hidden_states
                pl.BlockSpec((1, Skv, H), lambda b, qi: (b, 0, 0)),    # kv (DMA only on b change)
                weight_spec, bias_spec,    # query (scale folded in)
                weight_spec, bias_spec,    # key
                weight_spec, bias_spec,    # value
                weight_spec, bias_spec,    # out
            ],
            out_specs=pl.BlockSpec((1, tq, H), lambda b, qi: (b, qi, 0)),
            scratch_shapes=[
                pltpu.VMEM((num_heads, Skv, head_dim), jnp.bfloat16),  # K per head
                pltpu.VMEM((num_heads, Skv, head_dim), jnp.bfloat16),  # V per head
                pltpu.VMEM((tq, H), jnp.bfloat16),                     # assembled context
            ],
        ),
        compiler_params=pltpu.CompilerParams(**cp_kwargs),
        cost_estimate=cost,
    )(hs_b, kv_b, wq, bq, wk, bk, wv, bv, wo, bo)

    if sq_pad != Sq:
        out = out[:, :Sq, :]
    return out


def init_params(key, hidden_size):
    """Deterministic synthetic parameters (Linear weights stored as (H_in, H_out))."""
    keys = jax.random.split(key, 8)
    scale = 1.0 / math.sqrt(hidden_size)

    def lin(kw, kb):
        w = jax.random.uniform(kw, (hidden_size, hidden_size),
                               jnp.float32, -scale, scale)
        b = jax.random.uniform(kb, (hidden_size,), jnp.float32, -scale, scale)
        return w, b

    wq, bq = lin(keys[0], keys[1])
    wk, bk = lin(keys[2], keys[3])
    wv, bv = lin(keys[4], keys[5])
    wo, bo = lin(keys[6], keys[7])
    return (wq, bq, wk, bk, wv, bv, wo, bo)


def reference(hidden_states, kv, params, *, num_heads):
    """Plain-JAX f32 reference mirroring the PyTorch forward (eval mode)."""
    wq, bq, wk, bk, wv, bv, wo, bo = params
    B, Sq, H = hidden_states.shape
    _, Skv, _ = kv.shape
    hd = H // num_heads
    q = hidden_states @ wq + bq
    k = kv @ wk + bk
    v = kv @ wv + bv

    def split(x, S):
        return x.reshape(B, S, num_heads, hd).transpose(0, 2, 1, 3)

    qh, kh, vh = split(q, Sq), split(k, Skv), split(v, Skv)
    scores = jnp.einsum("bhqd,bhkd->bhqk", qh, kh) / math.sqrt(hd)
    probs = jax.nn.softmax(scores, axis=-1)
    ctx = jnp.einsum("bhqk,bhkd->bhqd", probs, vh)
    ctx = ctx.transpose(0, 2, 1, 3).reshape(B, Sq, H)
    return ctx @ wo + bo


if __name__ == "__main__":
    B, Sq, Skv, H, num_heads = 2, 8, 12, 32, 4

    key = jax.random.PRNGKey(0)
    k_hs, k_kv, k_par = jax.random.split(key, 3)
    hidden_states = jax.random.normal(k_hs, (B, Sq, H), jnp.float32)
    kv = jax.random.normal(k_kv, (B, Skv, H), jnp.float32)
    params = init_params(k_par, H)
    prepared = prepare_params(params, H, num_heads)      # one-time prep

    out = attention_cross_modal(hidden_states, kv, prepared, num_heads=num_heads)
    out = jax.block_until_ready(out)

    ref = reference(hidden_states, kv, params, num_heads=num_heads)
    assert out.shape == (B, Sq, H)
    # Kernel uses bf16 MXU operands (f32 accumulation + f32 softmax); compare
    # against the pure-f32 reference with a bf16-appropriate tolerance.
    assert jnp.allclose(out, ref, atol=3e-2, rtol=3e-2), "mismatch vs reference"

    print("KERNEL_OK")
</pallas_src>

<mosaic_0001>
module attributes {stable_mosaic.version = 11 : i64} {
  func.func @_attention_kernel(%arg0: i32, %arg1: i32, %arg2: memref<1x8x32xbf16, #tpu.memory_space<vmem>>, %arg3: memref<1x12x32xbf16, #tpu.memory_space<vmem>>, %arg4: memref<32x32xbf16, #tpu.memory_space<vmem>>, %arg5: memref<1x32xf32, #tpu.memory_space<vmem>>, %arg6: memref<32x32xbf16, #tpu.memory_space<vmem>>, %arg7: memref<1x32xf32, #tpu.memory_space<vmem>>, %arg8: memref<32x32xbf16, #tpu.memory_space<vmem>>, %arg9: memref<1x32xf32, #tpu.memory_space<vmem>>, %arg10: memref<32x32xbf16, #tpu.memory_space<vmem>>, %arg11: memref<1x32xf32, #tpu.memory_space<vmem>>, %arg12: memref<1x8x32xf32, #tpu.memory_space<vmem>>, %arg13: memref<4x12x8xbf16, #tpu.memory_space<vmem>>, %arg14: memref<4x12x8xbf16, #tpu.memory_space<vmem>>, %arg15: memref<8x32xbf16, #tpu.memory_space<vmem>>) attributes {dimension_semantics = [#tpu.dimension_semantics<parallel>, #tpu.dimension_semantics<arbitrary>], iteration_bounds = array<i64: 2, 1>, scalar_prefetch = 0 : i64, scratch_operands = 3 : i64, tpu.core_type = #tpu.core_type<tc>, window_params = [{transform_indices = @transform_0, window_bounds = array<i64: 1, 8, 32>}, {transform_indices = @transform_1, window_bounds = array<i64: 1, 12, 32>}, {pipeline_mode = #tpu.pipeline_mode<synchronous>, transform_indices = @transform_2, window_bounds = array<i64: 32, 32>}, {pipeline_mode = #tpu.pipeline_mode<synchronous>, transform_indices = @transform_3, window_bounds = array<i64: 1, 32>}, {pipeline_mode = #tpu.pipeline_mode<synchronous>, transform_indices = @transform_4, window_bounds = array<i64: 32, 32>}, {pipeline_mode = #tpu.pipeline_mode<synchronous>, transform_indices = @transform_5, window_bounds = array<i64: 1, 32>}, {pipeline_mode = #tpu.pipeline_mode<synchronous>, transform_indices = @transform_6, window_bounds = array<i64: 32, 32>}, {pipeline_mode = #tpu.pipeline_mode<synchronous>, transform_indices = @transform_7, window_bounds = array<i64: 1, 32>}, {pipeline_mode = #tpu.pipeline_mode<synchronous>, transform_indices = @transform_8, window_bounds = array<i64: 32, 32>}, {pipeline_mode = #tpu.pipeline_mode<synchronous>, transform_indices = @transform_9, window_bounds = array<i64: 1, 32>}, {transform_indices = @transform_10, window_bounds = array<i64: 1, 8, 32>}]} {
    %c0_i32 = arith.constant 0 : i32
    %0 = arith.cmpi eq, %arg1, %c0_i32 : i32
    %1 = arith.extui %0 : i1 to i32
    %c0_i32_0 = arith.constant 0 : i32
    %2 = arith.cmpi ne, %1, %c0_i32_0 : i32
    scf.if %2 {
      %c0_59 = arith.constant 0 : index
      %c0_60 = arith.constant 0 : index
      %c0_61 = arith.constant 0 : index
      %104 = vector.load %arg3[%c0_59, %c0_60, %c0_61] : memref<1x12x32xbf16, #tpu.memory_space<vmem>>, vector<1x12x32xbf16>
      %105 = vector.shape_cast %104 : vector<1x12x32xbf16> to vector<12x32xbf16>
      %c0_62 = arith.constant 0 : index
      %c0_63 = arith.constant 0 : index
      %106 = vector.load %arg6[%c0_62, %c0_63] : memref<32x32xbf16, #tpu.memory_space<vmem>>, vector<32x32xbf16>
      %cst_64 = arith.constant dense<0.000000e+00> : vector<12x32xf32>
      %107 = tpu.matmul %105, %106, %cst_64 {dimension_numbers = #tpu.dot_dimension_numbers<[1], [0], [0], [1], [0, 0, 1, 1], [], []>} : vector<12x32xbf16>, vector<32x32xbf16>, vector<12x32xf32> -> vector<12x32xf32>
      %c0_65 = arith.constant 0 : index
      %c0_66 = arith.constant 0 : index
      %108 = vector.load %arg7[%c0_65, %c0_66] : memref<1x32xf32, #tpu.memory_space<vmem>>, vector<1x32xf32>
      %109 = vector.shape_cast %108 : vector<1x32xf32> to vector<32xf32>
      %110 = vector.shape_cast %109 : vector<32xf32> to vector<1x32xf32>
      %111 = vector.broadcast %110 : vector<1x32xf32> to vector<12x32xf32>
      %112 = arith.addf %107, %111 : vector<12x32xf32>
      %c0_67 = arith.constant 0 : index
      %c0_68 = arith.constant 0 : index
      %113 = vector.load %arg8[%c0_67, %c0_68] : memref<32x32xbf16, #tpu.memory_space<vmem>>, vector<32x32xbf16>
      %cst_69 = arith.constant dense<0.000000e+00> : vector<12x32xf32>
      %114 = tpu.matmul %105, %113, %cst_69 {dimension_numbers = #tpu.dot_dimension_numbers<[1], [0], [0], [1], [0, 0, 1, 1], [], []>} : vector<12x32xbf16>, vector<32x32xbf16>, vector<12x32xf32> -> vector<12x32xf32>
      %c0_70 = arith.constant 0 : index
      %c0_71 = arith.constant 0 : index
      %115 = vector.load %arg9[%c0_70, %c0_71] : memref<1x32xf32, #tpu.memory_space<vmem>>, vector<1x32xf32>
      %116 = vector.shape_cast %115 : vector<1x32xf32> to vector<32xf32>
      %117 = vector.shape_cast %116 : vector<32xf32> to vector<1x32xf32>
      %118 = vector.broadcast %117 : vector<1x32xf32> to vector<12x32xf32>
      %119 = arith.addf %114, %118 : vector<12x32xf32>
      %120 = arith.truncf %112 : vector<12x32xf32> to vector<12x32xbf16>
      %121 = arith.truncf %119 : vector<12x32xf32> to vector<12x32xbf16>
      %122 = vector.extract_strided_slice %120 {offsets = [0, 0], sizes = [12, 8], strides = [1, 1]} : vector<12x32xbf16> to vector<12x8xbf16>
      %c0_72 = arith.constant 0 : index
      %c0_73 = arith.constant 0 : index
      %c0_74 = arith.constant 0 : index
      %123 = vector.load %arg13[%c0_72, %c0_73, %c0_74] : memref<4x12x8xbf16, #tpu.memory_space<vmem>>, vector<1x12x8xbf16>
      %124 = vector.shape_cast %123 : vector<1x12x8xbf16> to vector<12x8xbf16>
      %125 = vector.shape_cast %122 : vector<12x8xbf16> to vector<1x12x8xbf16>
      tpu.vector_store %arg13[%c0_72, %c0_73, %c0_74], %125 {strides = array<i32>} : memref<4x12x8xbf16, #tpu.memory_space<vmem>>, vector<1x12x8xbf16>,
      %126 = vector.extract_strided_slice %121 {offsets = [0, 0], sizes = [12, 8], strides = [1, 1]} : vector<12x32xbf16> to vector<12x8xbf16>
      %c0_75 = arith.constant 0 : index
      %c0_76 = arith.constant 0 : index
      %c0_77 = arith.constant 0 : index
      %127 = vector.load %arg14[%c0_75, %c0_76, %c0_77] : memref<4x12x8xbf16, #tpu.memory_space<vmem>>, vector<1x12x8xbf16>
      %128 = vector.shape_cast %127 : vector<1x12x8xbf16> to vector<12x8xbf16>
      %129 = vector.shape_cast %126 : vector<12x8xbf16> to vector<1x12x8xbf16>
      tpu.vector_store %arg14[%c0_75, %c0_76, %c0_77], %129 {strides = array<i32>} : memref<4x12x8xbf16, #tpu.memory_space<vmem>>, vector<1x12x8xbf16>,
      %130 = vector.extract_strided_slice %120 {offsets = [0, 8], sizes = [12, 8], strides = [1, 1]} : vector<12x32xbf16> to vector<12x8xbf16>
      %c1_78 = arith.constant 1 : index
      %c0_79 = arith.constant 0 : index
      %c0_80 = arith.constant 0 : index
      %131 = vector.load %arg13[%c1_78, %c0_79, %c0_80] : memref<4x12x8xbf16, #tpu.memory_space<vmem>>, vector<1x12x8xbf16>
      %132 = vector.shape_cast %131 : vector<1x12x8xbf16> to vector<12x8xbf16>
      %133 = vector.shape_cast %130 : vector<12x8xbf16> to vector<1x12x8xbf16>
      tpu.vector_store %arg13[%c1_78, %c0_79, %c0_80], %133 {strides = array<i32>} : memref<4x12x8xbf16, #tpu.memory_space<vmem>>, vector<1x12x8xbf16>,
      %134 = vector.extract_strided_slice %121 {offsets = [0, 8], sizes = [12, 8], strides = [1, 1]} : vector<12x32xbf16> to vector<12x8xbf16>
      %c1_81 = arith.constant 1 : index
      %c0_82 = arith.constant 0 : index
      %c0_83 = arith.constant 0 : index
      %135 = vector.load %arg14[%c1_81, %c0_82, %c0_83] : memref<4x12x8xbf16, #tpu.memory_space<vmem>>, vector<1x12x8xbf16>
      %136 = vector.shape_cast %135 : vector<1x12x8xbf16> to vector<12x8xbf16>
      %137 = vector.shape_cast %134 : vector<12x8xbf16> to vector<1x12x8xbf16>
      tpu.vector_store %arg14[%c1_81, %c0_82, %c0_83], %137 {strides = array<i32>} : memref<4x12x8xbf16, #tpu.memory_space<vmem>>, vector<1x12x8xbf16>,
      %138 = vector.extract_strided_slice %120 {offsets = [0, 16], sizes = [12, 8], strides = [1, 1]} : vector<12x32xbf16> to vector<12x8xbf16>
      %c2_84 = arith.constant 2 : index
      %c0_85 = arith.constant 0 : index
      %c0_86 = arith.constant 0 : index
      %139 = vector.load %arg13[%c2_84, %c0_85, %c0_86] : memref<4x12x8xbf16, #tpu.memory_space<vmem>>, vector<1x12x8xbf16>
      %140 = vector.shape_cast %139 : vector<1x12x8xbf16> to vector<12x8xbf16>
      %141 = vector.shape_cast %138 : vector<12x8xbf16> to vector<1x12x8xbf16>
      tpu.vector_store %arg13[%c2_84, %c0_85, %c0_86], %141 {strides = array<i32>} : memref<4x12x8xbf16, #tpu.memory_space<vmem>>, vector<1x12x8xbf16>,
      %142 = vector.extract_strided_slice %121 {offsets = [0, 16], sizes = [12, 8], strides = [1, 1]} : vector<12x32xbf16> to vector<12x8xbf16>
      %c2_87 = arith.constant 2 : index
      %c0_88 = arith.constant 0 : index
      %c0_89 = arith.constant 0 : index
      %143 = vector.load %arg14[%c2_87, %c0_88, %c0_89] : memref<4x12x8xbf16, #tpu.memory_space<vmem>>, vector<1x12x8xbf16>
      %144 = vector.shape_cast %143 : vector<1x12x8xbf16> to vector<12x8xbf16>
      %145 = vector.shape_cast %142 : vector<12x8xbf16> to vector<1x12x8xbf16>
      tpu.vector_store %arg14[%c2_87, %c0_88, %c0_89], %145 {strides = array<i32>} : memref<4x12x8xbf16, #tpu.memory_space<vmem>>, vector<1x12x8xbf16>,
      %146 = vector.extract_strided_slice %120 {offsets = [0, 24], sizes = [12, 8], strides = [1, 1]} : vector<12x32xbf16> to vector<12x8xbf16>
      %c3_90 = arith.constant 3 : index
      %c0_91 = arith.constant 0 : index
      %c0_92 = arith.constant 0 : index
      %147 = vector.load %arg13[%c3_90, %c0_91, %c0_92] : memref<4x12x8xbf16, #tpu.memory_space<vmem>>, vector<1x12x8xbf16>
      %148 = vector.shape_cast %147 : vector<1x12x8xbf16> to vector<12x8xbf16>
      %149 = vector.shape_cast %146 : vector<12x8xbf16> to vector<1x12x8xbf16>
      tpu.vector_store %arg13[%c3_90, %c0_91, %c0_92], %149 {strides = array<i32>} : memref<4x12x8xbf16, #tpu.memory_space<vmem>>, vector<1x12x8xbf16>,
      %150 = vector.extract_strided_slice %121 {offsets = [0, 24], sizes = [12, 8], strides = [1, 1]} : vector<12x32xbf16> to vector<12x8xbf16>
      %c3_93 = arith.constant 3 : index
      %c0_94 = arith.constant 0 : index
      %c0_95 = arith.constant 0 : index
      %151 = vector.load %arg14[%c3_93, %c0_94, %c0_95] : memref<4x12x8xbf16, #tpu.memory_space<vmem>>, vector<1x12x8xbf16>
      %152 = vector.shape_cast %151 : vector<1x12x8xbf16> to vector<12x8xbf16>
      %153 = vector.shape_cast %150 : vector<12x8xbf16> to vector<1x12x8xbf16>
      tpu.vector_store %arg14[%c3_93, %c0_94, %c0_95], %153 {strides = array<i32>} : memref<4x12x8xbf16, #tpu.memory_space<vmem>>, vector<1x12x8xbf16>,
    } else {
    }
    %c0 = arith.constant 0 : index
    %c0_1 = arith.constant 0 : index
    %c0_2 = arith.constant 0 : index
    %3 = vector.load %arg2[%c0, %c0_1, %c0_2] : memref<1x8x32xbf16, #tpu.memory_space<vmem>>, vector<1x8x32xbf16>
    %4 = vector.shape_cast %3 : vector<1x8x32xbf16> to vector<8x32xbf16>
    %c0_3 = arith.constant 0 : index
    %c0_4 = arith.constant 0 : index
    %5 = vector.load %arg4[%c0_3, %c0_4] : memref<32x32xbf16, #tpu.memory_space<vmem>>, vector<32x32xbf16>
    %cst = arith.constant dense<0.000000e+00> : vector<8x32xf32>
    %6 = tpu.matmul %4, %5, %cst {dimension_numbers = #tpu.dot_dimension_numbers<[1], [0], [0], [1], [0, 0, 1, 1], [], []>} : vector<8x32xbf16>, vector<32x32xbf16>, vector<8x32xf32> -> vector<8x32xf32>
    %c0_5 = arith.constant 0 : index
    %c0_6 = arith.constant 0 : index
    %7 = vector.load %arg5[%c0_5, %c0_6] : memref<1x32xf32, #tpu.memory_space<vmem>>, vector<1x32xf32>
    %8 = vector.shape_cast %7 : vector<1x32xf32> to vector<32xf32>
    %9 = vector.shape_cast %8 : vector<32xf32> to vector<1x32xf32>
    %10 = vector.broadcast %9 : vector<1x32xf32> to vector<8x32xf32>
    %11 = arith.addf %6, %10 : vector<8x32xf32>
    %12 = arith.truncf %11 : vector<8x32xf32> to vector<8x32xbf16>
    %13 = vector.extract_strided_slice %12 {offsets = [0, 0], sizes = [8, 8], strides = [1, 1]} : vector<8x32xbf16> to vector<8x8xbf16>
    %c0_7 = arith.constant 0 : index
    %c0_8 = arith.constant 0 : index
    %c0_9 = arith.constant 0 : index
    %14 = vector.load %arg13[%c0_7, %c0_8, %c0_9] : memref<4x12x8xbf16, #tpu.memory_space<vmem>>, vector<1x12x8xbf16>
    %15 = vector.shape_cast %14 : vector<1x12x8xbf16> to vector<12x8xbf16>
    %c0_10 = arith.constant 0 : index
    %c0_11 = arith.constant 0 : index
    %c0_12 = arith.constant 0 : index
    %16 = vector.load %arg14[%c0_10, %c0_11, %c0_12] : memref<4x12x8xbf16, #tpu.memory_space<vmem>>, vector<1x12x8xbf16>
    %17 = vector.shape_cast %16 : vector<1x12x8xbf16> to vector<12x8xbf16>
    %cst_13 = arith.constant dense<0.000000e+00> : vector<8x12xf32>
    %18 = tpu.matmul %13, %15, %cst_13 {dimension_numbers = #tpu.dot_dimension_numbers<[1], [1], [0], [0], [0, 0, 1, 0], [], []>} : vector<8x8xbf16>, vector<12x8xbf16>, vector<8x12xf32> -> vector<8x12xf32>
    %cst_14 = arith.constant dense<0xFF800000> : vector<8xf32>
    %19 = vector.multi_reduction <maximumf>, %18, %cst_14 [1] : vector<8x12xf32> to vector<8xf32>
    %20 = vector.shape_cast %19 : vector<8xf32> to vector<8x1xf32>
    %21 = vector.broadcast %20 : vector<8x1xf32> to vector<8x12xf32>
    %22 = arith.subf %18, %21 : vector<8x12xf32>
    %23 = math.exp %22 : vector<8x12xf32>
    %cst_15 = arith.constant dense<0.000000e+00> : vector<8xf32>
    %24 = vector.multi_reduction <add>, %23, %cst_15 [1] : vector<8x12xf32> to vector<8xf32>
    %25 = vector.shape_cast %24 : vector<8xf32> to vector<8x1xf32>
    %26 = tpu.reciprocal %25 {approx = true} : vector<8x1xf32> -> vector<8x1xf32>
    %27 = vector.broadcast %26 : vector<8x1xf32> to vector<8x12xf32>
    %28 = arith.mulf %23, %27 : vector<8x12xf32>
    %29 = arith.truncf %28 : vector<8x12xf32> to vector<8x12xbf16>
    %cst_16 = arith.constant dense<0.000000e+00> : vector<8x8xf32>
    %30 = tpu.matmul %29, %17, %cst_16 {dimension_numbers = #tpu.dot_dimension_numbers<[1], [0], [0], [1], [0, 0, 1, 1], [], []>} : vector<8x12xbf16>, vector<12x8xbf16>, vector<8x8xf32> -> vector<8x8xf32>
    %31 = arith.truncf %30 : vector<8x8xf32> to vector<8x8xbf16>
    %c0_17 = arith.constant 0 : index
    %c0_18 = arith.constant 0 : index
    %32 = vector.load %arg15[%c0_17, %c0_18] : memref<8x32xbf16, #tpu.memory_space<vmem>>, vector<8x8xbf16>
    tpu.vector_store %arg15[%c0_17, %c0_18], %31 {strides = array<i32>} : memref<8x32xbf16, #tpu.memory_space<vmem>>, vector<8x8xbf16>,
    %33 = vector.extract_strided_slice %12 {offsets = [0, 8], sizes = [8, 8], strides = [1, 1]} : vector<8x32xbf16> to vector<8x8xbf16>
    %c1 = arith.constant 1 : index
    %c0_19 = arith.constant 0 : index
    %c0_20 = arith.constant 0 : index
    %34 = vector.load %arg13[%c1, %c0_19, %c0_20] : memref<4x12x8xbf16, #tpu.memory_space<vmem>>, vector<1x12x8xbf16>
    %35 = vector.shape_cast %34 : vector<1x12x8xbf16> to vector<12x8xbf16>
    %c1_21 = arith.constant 1 : index
    %c0_22 = arith.constant 0 : index
    %c0_23 = arith.constant 0 : index
    %36 = vector.load %arg14[%c1_21, %c0_22, %c0_23] : memref<4x12x8xbf16, #tpu.memory_space<vmem>>, vector<1x12x8xbf16>
    %37 = vector.shape_cast %36 : vector<1x12x8xbf16> to vector<12x8xbf16>
    %cst_24 = arith.constant dense<0.000000e+00> : vector<8x12xf32>
    %38 = tpu.matmul %33, %35, %cst_24 {dimension_numbers = #tpu.dot_dimension_numbers<[1], [1], [0], [0], [0, 0, 1, 0], [], []>} : vector<8x8xbf16>, vector<12x8xbf16>, vector<8x12xf32> -> vector<8x12xf32>
    %cst_25 = arith.constant dense<0xFF800000> : vector<8xf32>
    %39 = vector.multi_reduction <maximumf>, %38, %cst_25 [1] : vector<8x12xf32> to vector<8xf32>
    %40 = vector.shape_cast %39 : vector<8xf32> to vector<8x1xf32>
    %41 = vector.broadcast %40 : vector<8x1xf32> to vector<8x12xf32>
    %42 = arith.subf %38, %41 : vector<8x12xf32>
    %43 = math.exp %42 : vector<8x12xf32>
    %cst_26 = arith.constant dense<0.000000e+00> : vector<8xf32>
    %44 = vector.multi_reduction <add>, %43, %cst_26 [1] : vector<8x12xf32> to vector<8xf32>
    %45 = vector.shape_cast %44 : vector<8xf32> to vector<8x1xf32>
    %46 = tpu.reciprocal %45 {approx = true} : vector<8x1xf32> -> vector<8x1xf32>
    %47 = vector.broadcast %46 : vector<8x1xf32> to vector<8x12xf32>
    %48 = arith.mulf %43, %47 : vector<8x12xf32>
    %49 = arith.truncf %48 : vector<8x12xf32> to vector<8x12xbf16>
    %cst_27 = arith.constant dense<0.000000e+00> : vector<8x8xf32>
    %50 = tpu.matmul %49, %37, %cst_27 {dimension_numbers = #tpu.dot_dimension_numbers<[1], [0], [0], [1], [0, 0, 1, 1], [], []>} : vector<8x12xbf16>, vector<12x8xbf16>, vector<8x8xf32> -> vector<8x8xf32>
    %51 = arith.truncf %50 : vector<8x8xf32> to vector<8x8xbf16>
    %c0_28 = arith.constant 0 : index
    %c8 = arith.constant 8 : index
    %52 = vector.load %arg15[%c0_28, %c8] : memref<8x32xbf16, #tpu.memory_space<vmem>>, vector<8x8xbf16>
    tpu.vector_store %arg15[%c0_28, %c8], %51 {strides = array<i32>} : memref<8x32xbf16, #tpu.memory_space<vmem>>, vector<8x8xbf16>,
    %53 = vector.extract_strided_slice %12 {offsets = [0, 16], sizes = [8, 8], strides = [1, 1]} : vector<8x32xbf16> to vector<8x8xbf16>
    %c2 = arith.constant 2 : index
    %c0_29 = arith.constant 0 : index
    %c0_30 = arith.constant 0 : index
    %54 = vector.load %arg13[%c2, %c0_29, %c0_30] : memref<4x12x8xbf16, #tpu.memory_space<vmem>>, vector<1x12x8xbf16>
    %55 = vector.shape_cast %54 : vector<1x12x8xbf16> to vector<12x8xbf16>
    %c2_31 = arith.constant 2 : index
    %c0_32 = arith.constant 0 : index
    %c0_33 = arith.constant 0 : index
    %56 = vector.load %arg14[%c2_31, %c0_32, %c0_33] : memref<4x12x8xbf16, #tpu.memory_space<vmem>>, vector<1x12x8xbf16>
    %57 = vector.shape_cast %56 : vector<1x12x8xbf16> to vector<12x8xbf16>
    %cst_34 = arith.constant dense<0.000000e+00> : vector<8x12xf32>
    %58 = tpu.matmul %53, %55, %cst_34 {dimension_numbers = #tpu.dot_dimension_numbers<[1], [1], [0], [0], [0, 0, 1, 0], [], []>} : vector<8x8xbf16>, vector<12x8xbf16>, vector<8x12xf32> -> vector<8x12xf32>
    %cst_35 = arith.constant dense<0xFF800000> : vector<8xf32>
    %59 = vector.multi_reduction <maximumf>, %58, %cst_35 [1] : vector<8x12xf32> to vector<8xf32>
    %60 = vector.shape_cast %59 : vector<8xf32> to vector<8x1xf32>
    %61 = vector.broadcast %60 : vector<8x1xf32> to vector<8x12xf32>
    %62 = arith.subf %58, %61 : vector<8x12xf32>
    %63 = math.exp %62 : vector<8x12xf32>
    %cst_36 = arith.constant dense<0.000000e+00> : vector<8xf32>
    %64 = vector.multi_reduction <add>, %63, %cst_36 [1] : vector<8x12xf32> to vector<8xf32>
    %65 = vector.shape_cast %64 : vector<8xf32> to vector<8x1xf32>
    %66 = tpu.reciprocal %65 {approx = true} : vector<8x1xf32> -> vector<8x1xf32>
    %67 = vector.broadcast %66 : vector<8x1xf32> to vector<8x12xf32>
    %68 = arith.mulf %63, %67 : vector<8x12xf32>
    %69 = arith.truncf %68 : vector<8x12xf32> to vector<8x12xbf16>
    %cst_37 = arith.constant dense<0.000000e+00> : vector<8x8xf32>
    %70 = tpu.matmul %69, %57, %cst_37 {dimension_numbers = #tpu.dot_dimension_numbers<[1], [0], [0], [1], [0, 0, 1, 1], [], []>} : vector<8x12xbf16>, vector<12x8xbf16>, vector<8x8xf32> -> vector<8x8xf32>
    %71 = arith.truncf %70 : vector<8x8xf32> to vector<8x8xbf16>
    %c0_38 = arith.constant 0 : index
    %c16 = arith.constant 16 : index
    %72 = vector.load %arg15[%c0_38, %c16] : memref<8x32xbf16, #tpu.memory_space<vmem>>, vector<8x8xbf16>
    tpu.vector_store %arg15[%c0_38, %c16], %71 {strides = array<i32>} : memref<8x32xbf16, #tpu.memory_space<vmem>>, vector<8x8xbf16>,
    %73 = vector.extract_strided_slice %12 {offsets = [0, 24], sizes = [8, 8], strides = [1, 1]} : vector<8x32xbf16> to vector<8x8xbf16>
    %c3 = arith.constant 3 : index
    %c0_39 = arith.constant 0 : index
    %c0_40 = arith.constant 0 : index
    %74 = vector.load %arg13[%c3, %c0_39, %c0_40] : memref<4x12x8xbf16, #tpu.memory_space<vmem>>, vector<1x12x8xbf16>
    %75 = vector.shape_cast %74 : vector<1x12x8xbf16> to vector<12x8xbf16>
    %c3_41 = arith.constant 3 : index
    %c0_42 = arith.constant 0 : index
    %c0_43 = arith.constant 0 : index
    %76 = vector.load %arg14[%c3_41, %c0_42, %c0_43] : memref<4x12x8xbf16, #tpu.memory_space<vmem>>, vector<1x12x8xbf16>
    %77 = vector.shape_cast %76 : vector<1x12x8xbf16> to vector<12x8xbf16>
    %cst_44 = arith.constant dense<0.000000e+00> : vector<8x12xf32>
    %78 = tpu.matmul %73, %75, %cst_44 {dimension_numbers = #tpu.dot_dimension_numbers<[1], [1], [0], [0], [0, 0, 1, 0], [], []>} : vector<8x8xbf16>, vector<12x8xbf16>, vector<8x12xf32> -> vector<8x12xf32>
    %cst_45 = arith.constant dense<0xFF800000> : vector<8xf32>
    %79 = vector.multi_reduction <maximumf>, %78, %cst_45 [1] : vector<8x12xf32> to vector<8xf32>
    %80 = vector.shape_cast %79 : vector<8xf32> to vector<8x1xf32>
    %81 = vector.broadcast %80 : vector<8x1xf32> to vector<8x12xf32>
    %82 = arith.subf %78, %81 : vector<8x12xf32>
    %83 = math.exp %82 : vector<8x12xf32>
    %cst_46 = arith.constant dense<0.000000e+00> : vector<8xf32>
    %84 = vector.multi_reduction <add>, %83, %cst_46 [1] : vector<8x12xf32> to vector<8xf32>
    %85 = vector.shape_cast %84 : vector<8xf32> to vector<8x1xf32>
    %86 = tpu.reciprocal %85 {approx = true} : vector<8x1xf32> -> vector<8x1xf32>
    %87 = vector.broadcast %86 : vector<8x1xf32> to vector<8x12xf32>
    %88 = arith.mulf %83, %87 : vector<8x12xf32>
    %89 = arith.truncf %88 : vector<8x12xf32> to vector<8x12xbf16>
    %cst_47 = arith.constant dense<0.000000e+00> : vector<8x8xf32>
    %90 = tpu.matmul %89, %77, %cst_47 {dimension_numbers = #tpu.dot_dimension_numbers<[1], [0], [0], [1], [0, 0, 1, 1], [], []>} : vector<8x12xbf16>, vector<12x8xbf16>, vector<8x8xf32> -> vector<8x8xf32>
    %91 = arith.truncf %90 : vector<8x8xf32> to vector<8x8xbf16>
    %c0_48 = arith.constant 0 : index
    %c24 = arith.constant 24 : index
    %92 = vector.load %arg15[%c0_48, %c24] : memref<8x32xbf16, #tpu.memory_space<vmem>>, vector<8x8xbf16>
    tpu.vector_store %arg15[%c0_48, %c24], %91 {strides = array<i32>} : memref<8x32xbf16, #tpu.memory_space<vmem>>, vector<8x8xbf16>,
    %c0_49 = arith.constant 0 : index
    %c0_50 = arith.constant 0 : index
    %93 = vector.load %arg15[%c0_49, %c0_50] : memref<8x32xbf16, #tpu.memory_space<vmem>>, vector<8x32xbf16>
    %c0_51 = arith.constant 0 : index
    %c0_52 = arith.constant 0 : index
    %94 = vector.load %arg10[%c0_51, %c0_52] : memref<32x32xbf16, #tpu.memory_space<vmem>>, vector<32x32xbf16>
    %cst_53 = arith.constant dense<0.000000e+00> : vector<8x32xf32>
    %95 = tpu.matmul %93, %94, %cst_53 {dimension_numbers = #tpu.dot_dimension_numbers<[1], [0], [0], [1], [0, 0, 1, 1], [], []>} : vector<8x32xbf16>, vector<32x32xbf16>, vector<8x32xf32> -> vector<8x32xf32>
    %c0_54 = arith.constant 0 : index
    %c0_55 = arith.constant 0 : index
    %96 = vector.load %arg11[%c0_54, %c0_55] : memref<1x32xf32, #tpu.memory_space<vmem>>, vector<1x32xf32>
    %97 = vector.shape_cast %96 : vector<1x32xf32> to vector<32xf32>
    %98 = vector.shape_cast %97 : vector<32xf32> to vector<1x32xf32>
    %99 = vector.broadcast %98 : vector<1x32xf32> to vector<8x32xf32>
    %100 = arith.addf %95, %99 : vector<8x32xf32>
    %c0_56 = arith.constant 0 : index
    %c0_57 = arith.constant 0 : index
    %c0_58 = arith.constant 0 : index
    %101 = vector.load %arg12[%c0_56, %c0_57, %c0_58] : memref<1x8x32xf32, #tpu.memory_space<vmem>>, vector<1x8x32xf32>
    %102 = vector.shape_cast %101 : vector<1x8x32xf32> to vector<8x32xf32>
    %103 = vector.shape_cast %100 : vector<8x32xf32> to vector<1x8x32xf32>
    tpu.vector_store %arg12[%c0_56, %c0_57, %c0_58], %103 {strides = array<i32>} : memref<1x8x32xf32, #tpu.memory_space<vmem>>, vector<1x8x32xf32>,
    return
  }
  func.func @transform_0(%arg0: i32, %arg1: i32) -> (i32, i32, i32) {
    %c0_i32 = arith.constant 0 : i32
    %c0_i32_0 = arith.constant 0 : i32
    return %arg0, %arg1, %c0_i32 : i32, i32, i32
  }
  func.func @transform_1(%arg0: i32, %arg1: i32) -> (i32, i32, i32) {
    %c0_i32 = arith.constant 0 : i32
    %c0_i32_0 = arith.constant 0 : i32
    %c0_i32_1 = arith.constant 0 : i32
    return %arg0, %c0_i32, %c0_i32_0 : i32, i32, i32
  }
  func.func @transform_2(%arg0: i32, %arg1: i32) -> (i32, i32) {
    %c0_i32 = arith.constant 0 : i32
    %c0_i32_0 = arith.constant 0 : i32
    %c0_i32_1 = arith.constant 0 : i32
    return %c0_i32, %c0_i32_0 : i32, i32
  }
  func.func @transform_3(%arg0: i32, %arg1: i32) -> (i32, i32) {
    %c0_i32 = arith.constant 0 : i32
    %c0_i32_0 = arith.constant 0 : i32
    %c0_i32_1 = arith.constant 0 : i32
    return %c0_i32, %c0_i32_0 : i32, i32
  }
  func.func @transform_4(%arg0: i32, %arg1: i32) -> (i32, i32) {
    %c0_i32 = arith.constant 0 : i32
    %c0_i32_0 = arith.constant 0 : i32
    %c0_i32_1 = arith.constant 0 : i32
    return %c0_i32, %c0_i32_0 : i32, i32
  }
  func.func @transform_5(%arg0: i32, %arg1: i32) -> (i32, i32) {
    %c0_i32 = arith.constant 0 : i32
    %c0_i32_0 = arith.constant 0 : i32
    %c0_i32_1 = arith.constant 0 : i32
    return %c0_i32, %c0_i32_0 : i32, i32
  }
  func.func @transform_6(%arg0: i32, %arg1: i32) -> (i32, i32) {
    %c0_i32 = arith.constant 0 : i32
    %c0_i32_0 = arith.constant 0 : i32
    %c0_i32_1 = arith.constant 0 : i32
    return %c0_i32, %c0_i32_0 : i32, i32
  }
  func.func @transform_7(%arg0: i32, %arg1: i32) -> (i32, i32) {
    %c0_i32 = arith.constant 0 : i32
    %c0_i32_0 = arith.constant 0 : i32
    %c0_i32_1 = arith.constant 0 : i32
    return %c0_i32, %c0_i32_0 : i32, i32
  }
  func.func @transform_8(%arg0: i32, %arg1: i32) -> (i32, i32) {
    %c0_i32 = arith.constant 0 : i32
    %c0_i32_0 = arith.constant 0 : i32
    %c0_i32_1 = arith.constant 0 : i32
    return %c0_i32, %c0_i32_0 : i32, i32
  }
  func.func @transform_9(%arg0: i32, %arg1: i32) -> (i32, i32) {
    %c0_i32 = arith.constant 0 : i32
    %c0_i32_0 = arith.constant 0 : i32
    %c0_i32_1 = arith.constant 0 : i32
    return %c0_i32, %c0_i32_0 : i32, i32
  }
  func.func @transform_10(%arg0: i32, %arg1: i32) -> (i32, i32, i32) {
    %c0_i32 = arith.constant 0 : i32
    %c0_i32_0 = arith.constant 0 : i32
    return %arg0, %arg1, %c0_i32 : i32, i32, i32
  }
}

</mosaic_0001>

<bundles_post_ra>
// kernel: attention_cross_modal.1
= control target key start
LH: loop header
LB: loop body
LE: loop exit
PB: predicated region body
PF: predicated region fallthrough
CT: control target
= control target key end

     0   :  { %15 = vsyncpa [#allocation6], 0  ;;  %s2046_s0 = inlined_call_operand.vmem [shape: bf16[2,8,32], index: 0, kind: input, shape index: {}]   ;;  %s2047_s1 = inlined_call_operand.vmem [shape: bf16[2,12,32], index: 1, kind: input, shape index: {}]   ;;  %s2048_s2 = inlined_call_operand.vmem [shape: bf16[32,32], index: 2, kind: input, shape index: {}]   ;;  %s2049_s3 = inlined_call_operand.vmem [shape: f32[1,32], index: 3, kind: input, shape index: {}]   ;;  %s2050_s4 = inlined_call_operand.vmem [shape: bf16[32,32], index: 4, kind: input, shape index: {}]   ;;  %s2051_s5 = inlined_call_operand.vmem [shape: f32[1,32], index: 5, kind: input, shape index: {}]   ;;  %s2052_s6 = inlined_call_operand.vmem [shape: bf16[32,32], index: 6, kind: input, shape index: {}]   ;;  %s2053_s7 = inlined_call_operand.vmem [shape: f32[1,32], index: 7, kind: input, shape index: {}]   ;;  %s2054_s8 = inlined_call_operand.vmem [shape: bf16[32,32], index: 8, kind: input, shape index: {}]   ;;  %s2055_s9 = inlined_call_operand.vmem [shape: f32[1,32], index: 9, kind: input, shape index: {}]   ;;  %s2056_s10 = inlined_call_operand.hbm [shape: f32[2,8,32], index: 10, kind: output, shape index: {}]  }
   0x1   :  { %17 = vsyncpa [#allocation6 + $0x1], 0  ;;  %s1782_s13 = smov 0   ;;  %s1784_s14 = smov 0  }
   0x2   :  { %s1786_s15 = smov 0   ;;  %s1788_s16 = smov 0  }
   0x3   :  { %s1790_s17 = smov 0   ;;  %s1792_s18 = smov 0  }
   0x4 LB: > { %s1373_s19 = sadd.s32 4294967295, %s1716_s18   ;;  %s1374_s20 = sadd.s32 4294967294, %s1716_s18   ;;  %s1716_s18 = sphi %s1792_s18, %s23_s18   ;;  %s1712_s17 = sphi %s1790_s17, %s2063_s17   ;;  %s1708_s16 = sphi %s1788_s16, %s2062_s16   ;;  %s1704_s15 = sphi %s1786_s15, %s2061_s15   ;;  %s1700_s14 = sphi %s1784_s14, %s2060_s14   ;;  %s1696_s13 = sphi %s1782_s13, %s2059_s13  }
   0x5   : > { %s35_s21 = sadd.s32 1, %s1712_s17  ;;  %s266_s22 = sadd.s32 1, %s1704_s15 }
   0x6   : > { %p37_p0 = scmp.ge.s32.totalorder %s35_s21, 2  ;;  %p276_p1 = scmp.ne.s32.totalorder %s1704_s15, %s1700_s14 }
   0x7   : > { %p277_p2 = scmp.eq.s32.totalorder %s1373_s19, 1  ;;  %p282_p3 = scmp.ne.s32.totalorder %s1700_s14, %s1696_s13 }
   0x8   : > { %s2065_s21 = smov (%p37_p0, %s35_s21), 0  ;;  %p283_p5 = scmp.eq.s32.totalorder %s1374_s20, 1 }
   0x9   : > { %p1822_p4 = por %p277_p2, %p276_p1  ;;  %s261_s24 = ssub.s32 %s1712_s17, %s2065_s21 }
   0xa   : > { %p1377_p6 = scmp.ge.s32.totalorder %s1716_s18, 1  ;;  %p264_p7 = scmp.eq.s32.totalorder %s261_s24, 0 }
   0xb   : > { %p1829_p8 = por %p283_p5, %p282_p3  ;;  %p343_p9 = scmp.lt.s32.totalorder %s1716_s18, 3 }
   0xc   : > { %s1835_s26 = scalar_select %p264_p7, %s1704_s15, %s266_s22  }
   0xd   : > { %p344_p10 = pnand %p1377_p6, %p343_p9 }
   0xe   : > { %v1605_v0 = vld [vmem:[%s2050_s4] sm:$0xff] (!%p344_p10)   ;;  %v1718_v1 = vmov (!%p344_p10), 0.0   ;;  %v1606_v2 = vld [vmem:[%s2050_s4 + $0x8] sm:$0xff] (!%p344_p10)   ;;  %vm1719_vm0 = vmmov (!%p344_p10), 0   ;;  %p388_p11 = scmp.lt.s32.totalorder (!%p344_p10), %s1708_s16, 1  ;;  %vm435_vm1 = vcmask (!%p344_p10), 261120  }
   0xf   : > { %347 = sbr.rel (%p344_p10) target bundleno = 1524 (0x5f4), region = 60  ;;  %1462 = vmatprep.subr.bf16.mxu0 (!%p344_p10), %v1718_v1  ;;  %1470 = vmatprep.subr.bf16.mxu1 (!%p344_p10), %v1718_v1  ;;  %v1608_v3 = vld [vmem:[%s2048_s2] sm:$0xff] (!%p344_p10)   ;;  %v1609_v5 = vld [vmem:[%s2048_s2 + $0x8] sm:$0xff] (!%p344_p10)   ;;  %vm553_vm2 = vcmask (!%p344_p10), 60416   ;;  %vm555_vm3 = vcmask (!%p344_p10), 58368   ;;  %s1720_s30 = smov (!%p344_p10), 112  }
  0x10   : > { %1463 = vmatpush3.bf16.msra.mxu0 (!%p344_p10), %v1605_v0  ;;  %1466 = vmatprep.mubr.msk.bf16.mxu0 (!%p344_p10), %vm1719_vm0, %v1718_v1  ;;  %v1610_v7 = vld [vmem:[%s2052_s6] sm:$0xff] (!%p344_p10)   ;;  %v1611_v8 = vld [vmem:[%s2052_s6 + $0x8] sm:$0xff] (!%p344_p10)   ;;  %vm698_vm4 = vcmask (!%p344_p10), 64512   ;;  %vm766_vm5 = vcmask (!%p344_p10), 1045504   ;;  %vm745_vm6 = vcmask (!%p344_p10), 97280   ;;  %s1723_s27 = smov (!%p344_p10), 8  }
  0x11   : > { %1464 = vmatprep.subr.bf16.mxu0 (!%p344_p10), %v1718_v1  ;;  %1474 = vmatprep.mubr.msk.bf16.mxu1 (!%p344_p10), %vm1719_vm0, %v1718_v1  ;;  %v1382_v9 = vld [vmem:[%s2051_s5] ss:$0 sm:$0xff] (!%p344_p10)  ;;  %vm943_vm7 = vcmask (!%p344_p10), 126016   ;;  %vm1074_vm8 = vcmask (!%p344_p10), 191616   ;;  %vm1205_vm9 = vcmask (!%p344_p10), 257216   ;;  %s1726_s24 = smov (!%p344_p10), [#allocation5]  }
  0x12   : > { %1471 = vmatpush3.bf16.msra.mxu1 (!%p344_p10), %v1610_v7  ;;  %v1395_v18 = vld [vmem:[%s2049_s3] ss:$0 sm:$0xff] (!%p344_p10) }
  0x13   : > { %1472 = vmatprep.subr.bf16.mxu1 (!%p344_p10), %v1718_v1  ;;  %v1387_v27 = vld [vmem:[%s2053_s7] ss:$0 sm:$0xff] (!%p344_p10) }
  0x14   : > { %1465 = vmatpush3.bf16.msra.mxu0 (!%p344_p10), %v1606_v2 }
  0x15   : > { %1478 = vmatprep.subr.bf16.mxu0 (!%p344_p10), %v1718_v1 }
  0x16   : > { %s389_s11 = scalar_select %p388_p11, %s1708_s16, 1  ;;  %1473 = vmatpush3.bf16.msra.mxu1 %v1611_v8 }
  0x17   : > { %1486 = vmatprep.subr.bf16.mxu1 %v1718_v1 }
  0x18   : > { %s1426_s12 = sshll.u32 %s389_s11, 3  ;;  %s1379_s28 = sshll.u32 %s389_s11, 2 }
  0x19   : > { %s399_s22 = scalar_lea.vmem %s2047_s1, %s1426_s12  ;;  %s394_s20 = scalar_lea.vmem %s2046_s0, %s1379_s28 }
  0x1a   : > { %v1607_v4 = vld [vmem:[%s399_s22] sm:$0x3f]   ;;  %s1721_s12 = smov 120   ;;  %s1722_s11 = smov 104  }
  0x1b   : > { %1467 = vmatmul.mubr.msk.bf16.vlgmr.msra.gmra.mrb[0].mxu0 %vm435_vm1, %v1607_v4  ;;  %v620_v6 = vld [vmem:[%s394_s20] sm:$0xf]  ;;  %1475 = vmatmul.mubr.msk.bf16.vlgmr.msra.gmra.mrb[0].mxu1 %vm435_vm1, %v1607_v4  ;;  %s1724_s28 = smov 16   ;;  %s1725_s20 = smov 24  }
  0x1c   : > { %1479 = vmatpush3.bf16.msra.mxu0 %v1608_v3  ;;  %1482 = vmatprep.mubr.msk.bf16.mxu0 %vm1719_vm0, %v1718_v1 }
  0x1d   : > { %1480 = vmatprep.subr.bf16.mxu0 %v1718_v1  ;;  %1488 = vmatprep.mubr.msk.bf16.mxu1 %vm1719_vm0, %v1718_v1 }
  0x20   : > { %1481 = vmatpush3.bf16.msra.mxu0 %v1609_v5 }
  0x21   : > { %1492 = vmatprep.subr.bf16.mxu0 %v1718_v1 }
  0x23   : > { %1483 = vmatmul.mubr.msk.bf16.vlgmr.msra.gmra.mrb[4].mxu0 %vm435_vm1, %v620_v6 }
  0x24   : > { %1494 = vmatprep.mubr.msk.bf16.mxu0 %vm1719_vm0, %v1718_v1 }
  0xee   : > { %v473_v10 = vpop.f32.mrb[0].mxu0  ;;  %v537_v28 = vpop.f32.mrb[0].mxu1 }
  0xef   : > { %v474_v11 = vadd.f32 %v1382_v9, %v473_v10  ;;  %v1468_v12 = vpop.f32.mrb[1].mxu0  ;;  %v538_v29 = vadd.f32 %v1387_v27, %v537_v28  ;;  %v1476_v30 = vpop.f32.mrb[1].mxu1 }
  0xf0   : > { %v476_v13 = vpop.f32.mrb[2].mxu0  ;;  %v540_v31 = vpop.f32.mrb[2].mxu1 }
  0xf1   : > { %v1427_v14 = vpack.c.bf16 %v474_v11, %v474_v11  ;;  %v477_v15 = vadd.f32 %v1382_v9, %v476_v13  ;;  %v1469_v16 = vpop.f32.mrb[3].mxu0  ;;  %v1909_v32 = vpack.c.bf16 %v538_v29, %v538_v29  ;;  %v541_v33 = vadd.f32 %v1387_v27, %v540_v31  ;;  %v1477_v34 = vpop.f32.mrb[3].mxu1 }
  0xf3   : > { %554 = vst.msk [vmem:[#allocation2] sm:$0xf] %vm553_vm2, %v1427_v14  ;;  %v1428_v17 = vpack.c.bf16 %v477_v15, %v477_v15  ;;  %584 = vrot.lane.b32.xlu1 %v1427_v14, %s1720_s30  ;;  %566 = vrot.lane.b32.xlu0 %v1427_v14, %s1721_s12  ;;  %564 = vst.msk [vmem:[#allocation3] sm:$0xf] %vm553_vm2, %v1909_v32  ;;  %v1913_v35 = vpack.c.bf16 %v541_v33, %v541_v33 }
  0xf5   : > { %556 = vst.msk [vmem:[#allocation2 + $0x4] sm:$0x3] %vm555_vm3, %v1428_v17  ;;  %565 = vst.msk [vmem:[#allocation3 + $0x4] sm:$0x3] %vm555_vm3, %v1913_v35 }
  0xf6   : > { %v682_v19 = vpop.f32.mrb[4].mxu0 }
  0xf7   : > { %586 = vrot.lane.b32.xlu1 %v1428_v17, %s1720_s30  ;;  %568 = vrot.lane.b32.xlu0 %v1428_v17, %s1721_s12  ;;  %v683_v20 = vadd.f32 %v1395_v18, %v682_v19  ;;  %v1484_v21 = vpop.f32.mrb[5].mxu0 }
  0xf8   : > { %v685_v22 = vpop.f32.mrb[6].mxu0 }
  0xf9   : > { %v1485_v23 = vpop.f32.mrb[7].mxu0  ;;  %v688_v24 = vpack.c.bf16 %v683_v20, %v683_v20 }
  0xfb   : > { %604 = vrot.lane.b32.xlu1 %v1428_v17, %s1722_s11  ;;  %602 = vrot.lane.b32.xlu0 %v1427_v14, %s1722_s11 }
  0xfc   : > { %v1612_v25 = vld [vmem:[#allocation2] sm:$0x3f]  }
  0xfd   : > { %v703_v26 = vsel %vm698_vm4, %v1612_v25, 0  ;;  %v1616_v36 = vld [vmem:[#allocation3] sm:$0x3f]  }
  0xfe   : > { %1487 = vmatpush3.bf16.xpose.msra.mxu1 %v703_v26  ;;  %v768_v37 = vsel %vm766_vm5, %v1616_v36, 0 }
  0xff   : > { %820 = vrot.lane.b32.xlu0 %v688_v24, %s1721_s12  ;;  %951 = vrot.lane.b32.xlu1 %v688_v24, %s1720_s30 }
 0x100   : > { %1498 = vmatprep.subr.bf16.mxu1 %v1718_v1  ;;  %1493 = vmatpush3.bf16.msra.mxu0 %v768_v37 }
 0x101   : > { %1504 = vmatprep.subr.bf16.mxu0 %v1718_v1 }
 0x103   : > { %1082 = vrot.lane.b32.xlu0 %v688_v24, %s1722_s11 }
 0x105   : > { %1489 = vmatmul.mubr.msk.bf16.vlgmr.msra.gmra.mrb[4].mxu1 %vm698_vm4, %v688_v24 }
 0x106   : > { %1500 = vmatprep.mubr.msk.bf16.mxu1 %vm1719_vm0, %v1718_v1 }
 0x165   : > { %v585_v38 = vpop.permute.xlu1 %584  ;;  %v567_v39 = vpop.permute.xlu0 %566 }
 0x166   : > { %591 = vst.msk [vmem:[#allocation2 + $0x10] sm:$0xf] %vm553_vm2, %v585_v38  ;;  %573 = vst.msk [vmem:[#allocation2 + $0x8] sm:$0xf] %vm553_vm2, %v567_v39 }
 0x169   : > { %v587_v40 = vpop.permute.xlu1 %586  ;;  %v569_v41 = vpop.permute.xlu0 %568 }
 0x16a   : > { %592 = vst.msk [vmem:[#allocation2 + $0x14] sm:$0x3] %vm555_vm3, %v587_v40  ;;  %574 = vst.msk [vmem:[#allocation2 + $0xc] sm:$0x3] %vm555_vm3, %v569_v41 }
 0x16d   : > { %v605_v42 = vpop.permute.xlu1 %604  ;;  %v603_v43 = vpop.permute.xlu0 %602 }
 0x16e   : > { %610 = vst.msk [vmem:[#allocation2 + $0x1c] sm:$0x3] %vm555_vm3, %v605_v42 }
 0x16f   : > { %609 = vst.msk [vmem:[#allocation2 + $0x18] sm:$0xf] %vm553_vm2, %v603_v43 }
 0x171   : > { %v1613_v44 = vld [vmem:[#allocation2 + $0x8] sm:$0x3f]   ;;  %v1614_v46 = vld [vmem:[#allocation2 + $0x10] sm:$0x3f]   ;;  %v821_v47 = vpop.permute.xlu0 %820  ;;  %v952_v50 = vpop.permute.xlu1 %951 }
 0x172   : > { %v831_v45 = vsel %vm698_vm4, %v1613_v44, 0  ;;  %v962_v48 = vsel %vm698_vm4, %v1614_v46, 0 }
 0x173   : > { %1499 = vmatpush3.bf16.xpose.msra.mxu1 %v831_v45 }
 0x174   : > { %1510 = vmatprep.subr.bf16.mxu1 %v1718_v1 }
 0x175   : > { %v1083_v52 = vpop.permute.xlu0 %1082 }
 0x176   : > { %v1615_v49 = vld [vmem:[#allocation2 + $0x18] sm:$0x3f]  }
 0x177   : > { %v1093_v51 = vsel %vm698_vm4, %v1615_v49, 0 }
 0x17a   : > { %1501 = vmatmul.mubr.msk.bf16.vlgmr.msra.gmra.mrb[8].mxu1 %vm698_vm4, %v821_v47 }
 0x17b   : > { %1511 = vmatpush3.bf16.xpose.msra.mxu1 %v962_v48  ;;  %1512 = vmatprep.mubr.msk.bf16.mxu1 %vm1719_vm0, %v1718_v1 }
 0x17c   : > { %1522 = vmatprep.subr.bf16.mxu1 %v1718_v1 }
 0x182   : > { %1513 = vmatmul.mubr.msk.bf16.vlgmr.msra.gmra.mrb[12].mxu1 %vm698_vm4, %v952_v50 }
 0x183   : > { %1523 = vmatpush3.bf16.xpose.msra.mxu1 %v1093_v51  ;;  %1524 = vmatprep.mubr.msk.bf16.mxu1 %vm1719_vm0, %v1718_v1 }
 0x184   : > { %1534 = vmatprep.subr.bf16.mxu1 %v1718_v1 }
 0x18a   : > { %1525 = vmatmul.mubr.msk.bf16.vlgmr.msra.gmra.mrb[16].mxu1 %vm698_vm4, %v1083_v52 }
 0x18b   : > { %1538 = vmatprep.mubr.msk.bf16.mxu1 %vm1719_vm0, %v1718_v1 }
 0x1d8   : > { %v739_v53 = vpop.f32.mrb[4].mxu1 }
 0x1d9   : > { %v1490_v54 = vpop.f32.mrb[5].mxu1  ;;  %v746_v55 = vsel %vm745_vm6, %v739_v53, -inf }
 0x1da   : > { %747 = vmax.xlane.f32.xlu1 %v746_v55  ;;  %v742_v56 = vpop.f32.mrb[6].mxu1 }
 0x1db   : > { %v1491_v57 = vpop.f32.mrb[7].mxu1 }
 0x24d   : > { %v867_v58 = vpop.f32.mrb[8].mxu1 }
 0x24e   : > { %v1502_v59 = vpop.f32.mrb[9].mxu1  ;;  %v873_v60 = vsel %vm745_vm6, %v867_v58, -inf }
 0x24f   : > { %874 = vmax.xlane.f32.xlu0 %v873_v60  ;;  %v870_v61 = vpop.f32.mrb[10].mxu1 }
 0x250   : > { %v1503_v62 = vpop.f32.mrb[11].mxu1 }
 0x255   : > { %v998_v63 = vpop.f32.mrb[12].mxu1 }
 0x256   : > { %v1514_v0 = vpop.f32.mrb[13].mxu1  ;;  %v1004_v2 = vsel %vm745_vm6, %v998_v63, -inf }
 0x257   : > { %1005 = vmax.xlane.f32.xlu0 %v1004_v2  ;;  %v1001_v3 = vpop.f32.mrb[14].mxu1 }
 0x258   : > { %v1515_v4 = vpop.f32.mrb[15].mxu1 }
 0x25d   : > { %v1129_v5 = vpop.f32.mrb[16].mxu1 }
 0x25e   : > { %v1526_v6 = vpop.f32.mrb[17].mxu1  ;;  %v1135_v7 = vsel %vm745_vm6, %v1129_v5, -inf }
 0x25f   : > { %1136 = vmax.xlane.f32.xlu1 %v1135_v7  ;;  %v1132_v8 = vpop.f32.mrb[18].mxu1 }
 0x260   : > { %v1527_v9 = vpop.f32.mrb[19].mxu1 }
 0x267   : > { %v748_v10 = vpop.xlane.xlu1 %747 }
 0x268   : > { %v749_v11 = vsub.f32 %v739_v53, %v748_v10  ;;  %v1620_v10 = vld [vmem:[%s2054_s8] sm:$0xff]  }
 0x269   : > { %1535 = vmatpush3.bf16.msra.mxu1 %v1620_v10 }
 0x26a   : > { %v750_v12 = vmul.f32 1.442695, %v749_v11  ;;  %v1621_v11 = vld [vmem:[%s2054_s8 + $0x8] sm:$0xff]   ;;  %1536 = vmatprep.subr.bf16.mxu1 %v1718_v1 }
 0x26c   : > { %1622 = vpow2.f32 %v750_v12 }
 0x26d   : > { %1537 = vmatpush3.bf16.msra.mxu1 %v1621_v11 }
 0x276   : > { %v1623_v13 = vpop.eup %1622 }
 0x277   : > { %v752_v14 = vsel %vm745_vm6, %v1623_v13, 0.0 }
 0x278   : > { %753 = vadd.xlane.f32.xlu0 %v752_v14 }
 0x28e   : > { %577 = vrot.lane.b32.xlu0 %v1913_v35, %s1721_s12 }
 0x2dc   : > { %v875_v15 = vpop.xlane.xlu0 %874 }
 0x2dd   : > { %v876_v16 = vsub.f32 %v867_v58, %v875_v15 }
 0x2df   : > { %v877_v17 = vmul.f32 1.442695, %v876_v16 }
 0x2e1   : > { %1624 = vpow2.f32 %v877_v17 }
 0x2e4   : > { %v1006_v18 = vpop.xlane.xlu0 %1005 }
 0x2e5   : > { %v1007_v19 = vsub.f32 %v998_v63, %v1006_v18 }
 0x2e7   : > { %v1008_v20 = vmul.f32 1.442695, %v1007_v19 }
 0x2e9   : > { %1626 = vpow2.f32 %v1008_v20  ;;  %v1418_v20 = vld [vmem:[%s2055_s9] ss:$0 sm:$0xff] }
 0x2eb   : > { %v1625_v21 = vpop.eup %1624 }
 0x2ec   : > { %v879_v22 = vsel %vm745_vm6, %v1625_v21, 0.0  ;;  %v1137_v26 = vpop.xlane.xlu1 %1136 }
 0x2ed   : > { %880 = vadd.xlane.f32.xlu1 %v879_v22  ;;  %v1138_v28 = vsub.f32 %v1129_v5, %v1137_v26 }
 0x2ef   : > { %v1139_v30 = vmul.f32 1.442695, %v1138_v28 }
 0x2f3   : > { %v1627_v23 = vpop.eup %1626 }
 0x2f4   : > { %v1010_v24 = vsel %vm745_vm6, %v1627_v23, 0.0 }
 0x2f5   : > { %1011 = vadd.xlane.f32.xlu0 %v1010_v24 }
 0x2fe   : > { %575 = vrot.lane.b32.xlu1 %v1909_v32, %s1721_s12 }
 0x305   : > { %v754_v25 = vpop.xlane.xlu0 %753 }
 0x306   : > { %1628 = vrcp.f32 %v754_v25 }
 0x307   : > { %1630 = vpow2.f32 %v1139_v30 }
 0x309   : > { %v578_v27 = vpop.permute.xlu0 %577 }
 0x30a   : > { %583 = vst.msk [vmem:[#allocation3 + $0xc] sm:$0x3] %vm555_vm3, %v578_v27 }
 0x30b   : > { %593 = vrot.lane.b32.xlu0 %v1909_v32, %s1720_s30 }
 0x30f   : > { %595 = vrot.lane.b32.xlu0 %v1913_v35, %s1720_s30 }
 0x310   : > { %v1629_v29 = vpop.eup %1628 }
 0x311   : > { %v756_v31 = vmul.f32 %v1629_v29, %v1623_v13  ;;  %v1631_v34 = vpop.eup %1630 }
 0x312   : > { %v1141_v36 = vsel %vm745_vm6, %v1631_v34, 0.0 }
 0x313   : > { %611 = vrot.lane.b32.xlu0 %v1909_v32, %s1722_s11  ;;  %v757_v33 = vpack.c.bf16 %v756_v31, %v756_v31 }
 0x315   : > { %1495 = vmatmul.mubr.msk.bf16.vlgmr.msra.gmra.mrb[8].mxu0 %vm745_vm6, %v757_v33 }
 0x316   : > { %1506 = vmatprep.mubr.msk.bf16.mxu0 %vm1719_vm0, %v1718_v1 }
 0x317   : > { %613 = vrot.lane.b32.xlu0 %v1913_v35, %s1722_s11  ;;  %s385_s11 = sand.u32 1, %s1700_s14  }
 0x318   : > { %s1378_s22 = sshll.u32 %s385_s11, 3 }
 0x319   : > { %s387_s29 = scalar_lea.vmem [#allocation5], %s1378_s22 }
 0x31a   : > { %s1290_s30 = sshll.u32 %s387_s29, 4  ;;  %s2000_s30 = int_to_ptr.vmem [resolvable:$true] %s1290_s30 }
 0x31b   : > { %s1638_s22 = scalar_lea.vmem %s2000_s30, 128 }
 0x31c   : > { %p1639_p12 = scmp.ne.s32.totalorder %s2000_s30, %s1638_s22 }
 0x31e   : > { %p1640_p13 = pnand %p1639_p12, %p1822_p4 }
 0x320   : > { %p1641_p0 = pneg %p1640_p13 }
 0x322   : > { %1142 = vadd.xlane.f32.xlu1 %v1141_v36 }
 0x37a   : > { %v881_v37 = vpop.xlane.xlu1 %880 }
 0x37b   : > { %1632 = vrcp.f32 %v881_v37 }
 0x37e   : > { %v576_v38 = vpop.permute.xlu1 %575 }
 0x37f   : > { %582 = vst.msk [vmem:[#allocation3 + $0x8] sm:$0xf] %vm553_vm2, %v576_v38 }
 0x382   : > { %v1012_v32 = vpop.xlane.xlu0 %1011 }
 0x383   : > { %1634 = vrcp.f32 %v1012_v32 }
 0x385   : > { %v1633_v39 = vpop.eup %1632 }
 0x386   : > { %v883_v40 = vmul.f32 %v1633_v39, %v1625_v21  ;;  %v594_v41 = vpop.permute.xlu0 %593  ;;  %v1617_v42 = vld [vmem:[#allocation3 + $0x8] sm:$0x3f]  }
 0x387   : > { %600 = vst.msk [vmem:[#allocation3 + $0x10] sm:$0xf] %vm553_vm2, %v594_v41  ;;  %v894_v43 = vsel %vm766_vm5, %v1617_v42, 0 }
 0x388   : > { %1505 = vmatpush3.bf16.msra.mxu0 %v894_v43  ;;  %v884_v44 = vpack.c.bf16 %v883_v40, %v883_v40 }
 0x389   : > { %1516 = vmatprep.subr.bf16.mxu0 %v1718_v1 }
 0x38a   : > { %v596_v35 = vpop.permute.xlu0 %595 }
 0x38b   : > { %601 = vst.msk [vmem:[#allocation3 + $0x14] sm:$0x3] %vm555_vm3, %v596_v35  ;;  %1507 = vmatmul.mubr.msk.bf16.vlgmr.msra.gmra.mrb[12].mxu0 %vm745_vm6, %v884_v44 }
 0x38c   : > { %1518 = vmatprep.mubr.msk.bf16.mxu0 %vm1719_vm0, %v1718_v1 }
 0x38d   : > { %v1635_v46 = vpop.eup %1634 }
 0x38e   : > { %v612_v45 = vpop.permute.xlu0 %611  ;;  %v1014_v47 = vmul.f32 %v1635_v46, %v1627_v23 }
 0x38f   : > { %618 = vst.msk [vmem:[#allocation3 + $0x18] sm:$0xf] %vm553_vm2, %v612_v45 }
 0x390   : > { %v1015_v51 = vpack.c.bf16 %v1014_v47, %v1014_v47 }
 0x392   : > { %v614_v48 = vpop.permute.xlu0 %613  ;;  %v1618_v49 = vld [vmem:[#allocation3 + $0x10] sm:$0x3f]  }
 0x393   : > { %619 = vst.msk [vmem:[#allocation3 + $0x1c] sm:$0x3] %vm555_vm3, %v614_v48  ;;  %v1025_v50 = vsel %vm766_vm5, %v1618_v49, 0 }
 0x394   : > { %1517 = vmatpush3.bf16.msra.mxu0 %v1025_v50 }
 0x395   : > { %1528 = vmatprep.subr.bf16.mxu0 %v1718_v1 }
 0x397   : > { %1519 = vmatmul.mubr.msk.bf16.vlgmr.msra.gmra.mrb[16].mxu0 %vm745_vm6, %v1015_v51 }
 0x398   : > { %1530 = vmatprep.mubr.msk.bf16.mxu0 %vm1719_vm0, %v1718_v1 }
 0x39a   : > { %v1619_v52 = vld [vmem:[#allocation3 + $0x18] sm:$0x3f]  }
 0x39b   : > { %v1156_v53 = vsel %vm766_vm5, %v1619_v52, 0 }
 0x39c   : > { %1529 = vmatpush3.bf16.msra.mxu0 %v1156_v53 }
 0x3af   : > { %v1143_v54 = vpop.xlane.xlu1 %1142 }
 0x3b0   : > { %1636 = vrcp.f32 %v1143_v54 }
 0x3ba   : > { %v1637_v55 = vpop.eup %1636 }
 0x3bb   : > { %v1145_v56 = vmul.f32 %v1637_v55, %v1631_v34 }
 0x3bd   : > { %v1146_v57 = vpack.c.bf16 %v1145_v56, %v1145_v56 }
 0x3bf   : > { %1531 = vmatmul.mubr.msk.bf16.vlgmr.msra.gmra.mrb[20].mxu0 %vm745_vm6, %v1146_v57 }
 0x3e8   : > { %v804_v58 = vpop.f32.mrb[8].mxu0 }
 0x3e9   : > { %v810_v59 = vpack.c.bf16 %v804_v58, %v804_v58  ;;  %v1496_v60 = vpop.f32.mrb[9].mxu0 }
 0x3ea   : > { %v807_v61 = vpop.f32.mrb[10].mxu0 }
 0x3eb   : > { %812 = vst.msk [vmem:[#allocation4] sm:$0xf] %vm553_vm2, %v810_v59  ;;  %v1497_v62 = vpop.f32.mrb[11].mxu0 }
 0x45e   : > { %v930_v63 = vpop.f32.mrb[12].mxu0 }
 0x45f   : > { %v1431_v0 = vpack.c.bf16 %v930_v63, %v930_v63  ;;  %v1508_v2 = vpop.f32.mrb[13].mxu0 }
 0x460   : > { %v933_v3 = vpop.f32.mrb[14].mxu0 }
 0x461   : > { %940 = vrot.lane.b32.xlu0 %v1431_v0, %s1723_s27  ;;  %v1509_v4 = vpop.f32.mrb[15].mxu0  ;;  %s1642_s27 = sshll.u32 %s1726_s24, 4  ;;  %s1643_s27 = int_to_ptr.vmem [resolvable:$false] %s1642_s27 }
 0x462   : > { %p1645_p1 = scmp.lt.s32.totalorder %s2000_s30, %s1643_s27 }
 0x46a   : > { %v1061_v5 = vpop.f32.mrb[16].mxu0 }
 0x46b   : > { %v1432_v6 = vpack.c.bf16 %v1061_v5, %v1061_v5  ;;  %v1520_v7 = vpop.f32.mrb[17].mxu0 }
 0x46c   : > { %v1064_v8 = vpop.f32.mrb[18].mxu0 }
 0x46d   : > { %1071 = vrot.lane.b32.xlu0 %v1432_v6, %s1724_s28  ;;  %v1521_v9 = vpop.f32.mrb[19].mxu0  ;;  %s1423_s28 = sshll.u32 %s1708_s16, 7  ;;  %s1276_s16 = scalar_lea.sflag [#allocation6], %s385_s11 }
 0x492   : > { %v1192_v12 = vpop.f32.mrb[20].mxu0 }
 0x493   : > { %v1433_v13 = vpack.c.bf16 %v1192_v12, %v1192_v12  ;;  %v1532_v14 = vpop.f32.mrb[21].mxu0 }
 0x494   : > { %v1195_v15 = vpop.f32.mrb[22].mxu0 }
 0x495   : > { %1202 = vrot.lane.b32.xlu0 %v1433_v13, %s1725_s20  ;;  %v1533_v16 = vpop.f32.mrb[23].mxu0  ;;  %s1998_s20 = scalar_lea.hbm %s2056_s10, %s1423_s28  ;;  %s1644_s28 = scalar_lea.vmem %s1643_s27, 256 }
 0x496   : > { %p1646_p2 = scmp.lt.s32.totalorder %s1644_s28, %s1638_s22 }
 0x498   : > { %p1647_p3 = por %p1646_p2, %p1645_p1 }
 0x49a   : > { %p1648_p5 = pnand %p1647_p3, %p1641_p0 }
 0x4d3   : > { %v941_v17 = vpop.permute.xlu0 %940 }
 0x4d4   : > { %944 = vst.msk [vmem:[#allocation4] sm:$0xf] %vm943_vm7, %v941_v17 }
 0x4df   : > { %v1072_v18 = vpop.permute.xlu0 %1071 }
 0x4e0   : > { %1075 = vst.msk [vmem:[#allocation4] sm:$0xf] %vm1074_vm8, %v1072_v18 }
 0x507   : > { %v1203_v19 = vpop.permute.xlu0 %1202 }
 0x508   : > { %1206 = vst.msk [vmem:[#allocation4] sm:$0xf] %vm1205_vm9, %v1203_v19 }
 0x50f   : > { %v1207_v1 = vld [vmem:[#allocation4] sm:$0xf] }
 0x510   : > { %1539 = vmatmul.mubr.msk.bf16.vlgmr.msra.gmra.mrb[20].mxu1 %vm435_vm1, %v1207_v1 }
 0x5e3   : > { %v1268_v21 = vpop.f32.mrb[20].mxu1 }
 0x5e4   : > { %v1269_v22 = vadd.f32 %v1418_v20, %v1268_v21  ;;  %v1540_v23 = vpop.f32.mrb[21].mxu1 }
 0x5e5   : > { %v1271_v24 = vpop.f32.mrb[22].mxu1 }
 0x5e6   : > { %v1541_v25 = vpop.f32.mrb[23].mxu1  ;;  %1274 = vst.msk [vmem:[%s387_s29] sm:$0xff] %vm435_vm1, %v1269_v22 }
 0x5e7   : > { %1651 = shalt.err (!%p1648_p5)
}
 0x5e8   : > { %s1652_s11 = scalar_lea.hbm %s1998_s20, 128  ;;  %s1656_s19 = scalar_lea.hbm %s2056_s10, 256 }
 0x5e9   : > { %p1653_p6 = scmp.ne.s32.totalorder %s1998_s20, %s1652_s11  ;;  %p1657_p10 = scmp.lt.u32.totalorder %s1998_s20, %s2056_s10 }
 0x5ea   : > { %p1658_p11 = scmp.lt.u32.totalorder %s1656_s19, %s1652_s11  ;;  %p1660_p13 = scmp.lt.u32.totalorder %s1652_s11, %s1998_s20 }
 0x5eb   : > { %p1654_p7 = pnand %p1653_p6, %p1822_p4 }
 0x5ec   : > { %p1659_p12 = por %p1658_p11, %p1657_p10 }
 0x5ed   : > { %p1655_p9 = pneg %p1654_p7 }
 0x5ee   : > { %p1661_p0 = por %p1660_p13, %p1659_p12 }
 0x5f0   : > { %p1662_p1 = pnand %p1661_p0, %p1655_p9 }
 0x5f2   : > { %1665 = shalt.err (!%p1662_p1)
}
 0x5f3   : > { %1542 = dma.vmem_to_hbm [thread:$0]  (%p1822_p4), %s2000_s30, 128, %s1998_s20, %s1276_s16  }
 0x5f4 PF: > { %p1548_p2 = scmp.ge.s32.totalorder %s1716_s18, 2  ;;  %s1302_s22 = sand.u32 1, %s1696_s13  }
 0x5f5   : > { %s1303_s28 = scalar_lea.sflag [#allocation6], %s1302_s22 }
 0x5f6   : > { %p1545_p3 = pnand %p1548_p2, %p1829_p8 }
 0x5f8   : > { %1691 = dma.done.wait (!%p1545_p3), %s1303_s28, 128  }
 0x5f9   : > { %1693 = vsyncadd (!%p1545_p3), %s1303_s28, 4294967168  ;;  %s23_s18 = sadd.s32 1, %s1716_s18   ;;  %s2059_s13 = smov %s1700_s14 }
 0x5fa   : > { %p20_p5 = scmp.ge.s32.totalorder %s23_s18, 4   ;;  %s2060_s14 = smov %s1704_s15 }
 0x5fb   : > { %s2061_s15 = smov %s1835_s26  ;;  %s2062_s16 = smov %s1712_s17 }
 0x5fc   : > { %s2063_s17 = smov %s2065_s21  ;;  %22 = sbr.rel (!%p20_p5) target bundleno = 4 (0x4), region = 114 }
 0x603   :  { %1308 = vsyncpa [#allocation6], 1 }
 0x604   :  { %1310 = vsyncpa [#allocation6 + $0x1], 1 }

</bundles_post_ra>
